<compile_context>
chip_gen: v5e
topology: v5e:2x2
jax: 0.10.0
libtpu: 0.0.40
codegen_flags: <defaults>
</compile_context>

<pallas_src>
import numpy as np
import jax
import jax.numpy as jnp
from jax.experimental import pallas as pl
from jax.experimental.pallas import tpu as pltpu


def _make_blur_kernel(H, W):
    """Kernel factory: blur P flattened planes of shape (H, W) at once."""
    HW = H * W

    def kernel(x_ref, o_ref):
        # x_ref / o_ref: (P, H*W) in VMEM; each row is one flattened plane.
        x = x_ref[...].astype(jnp.float32)
        lane = jax.lax.broadcasted_iota(jnp.int32, x.shape, 1)  # flat col index

        # Vertical [1,2,1] pass: neighbours live +-W lanes away inside a row.
        # Rolls wrap within the same plane; masks implement the zero padding.
        up = jnp.where(lane >= W, pltpu.roll(x, W, axis=1), 0.0)
        down = jnp.where(lane < HW - W, pltpu.roll(x, HW - W, axis=1), 0.0)
        v = 2.0 * x + up + down

        # Horizontal [1,2,1] pass: neighbours are +-1 lanes, masked at the
        # image columns 0 / W-1 (zero padding on the left/right border).
        col = lane % W
        left = jnp.where(col >= 1, pltpu.roll(v, 1, axis=1), 0.0)
        right = jnp.where(col <= W - 2, pltpu.roll(v, HW - 1, axis=1), 0.0)

        # Combined normalization: ([1,2,1] x [1,2,1]) / 16.
        o_ref[...] = ((2.0 * v + left + right) * (1.0 / 16.0)).astype(o_ref.dtype)

    return kernel


def _planes_per_block(planes, plane_bytes, target_block_bytes=2 << 20):
    """Pick how many planes to process per grid step (keeps VMEM modest)."""
    p = max(1, target_block_bytes // max(1, plane_bytes))
    if p >= planes:
        return planes                      # full axis -> always a legal block
    return max(8, (p // 8) * 8)            # keep sublane dim a multiple of 8


def make_blur_weights(channel):
    """Mirror Blur.__init__: (channel,1,3,3) weight and flipped weight."""
    w = jnp.array([[1., 2., 1.], [2., 4., 2.], [1., 2., 1.]], dtype=jnp.float32)
    w = w / jnp.sum(w)
    weight = jnp.broadcast_to(w[None, None], (channel, 1, 3, 3))
    weight_flip = jnp.broadcast_to(w[::-1, ::-1][None, None], (channel, 1, 3, 3))
    return weight, weight_flip


def blur_forward(x, weight=None):
    """Depthwise 3x3 blur, padding=1, groups=C  (== F.conv2d in the module).

    x : (N, C, H, W).  `weight` is accepted for API parity but the (shared,
    symmetric) taps are baked into the kernel, exactly matching this module.
    """
    N, C, H, W = x.shape
    planes = N * C
    HW = H * W

    # Free relayout: contiguous NCHW -> one row per plane.
    x2 = x.reshape(planes, HW)

    P = _planes_per_block(planes, HW * jnp.dtype(x.dtype).itemsize)

    out = pl.pallas_call(
        _make_blur_kernel(H, W),
        out_shape=jax.ShapeDtypeStruct((planes, HW), x.dtype),
        grid=(pl.cdiv(planes, P),),
        in_specs=[pl.BlockSpec((P, HW), lambda i: (i, 0))],
        out_specs=pl.BlockSpec((P, HW), lambda i: (i, 0)),
        compiler_params=pltpu.CompilerParams(
            dimension_semantics=("parallel",)),
    )(x2)

    return out.reshape(N, C, H, W)


class Blur:
    """JAX/Pallas port of the PyTorch Blur module (forward pass)."""

    def __init__(self, channel):
        self.weight, self.weight_flip = make_blur_weights(channel)

    def __call__(self, x):
        return blur_forward(x, self.weight)


def _reference_blur(x, weight):
    """Plain-JAX reference (depthwise 3x3, zero pad=1) for verification."""
    N, C, H, W = x.shape
    taps = np.asarray(weight[0, 0])
    xp = jnp.pad(x, ((0, 0), (0, 0), (1, 1), (1, 1)))
    out = jnp.zeros_like(x)
    for dy in range(3):
        for dx in range(3):
            out = out + taps[dy, dx] * xp[:, :, dy:dy + H, dx:dx + W]
    return out


if __name__ == "__main__":
    key = jax.random.PRNGKey(0)
    N, C, H, W = 2, 4, 16, 16
    x = jax.random.normal(key, (N, C, H, W), dtype=jnp.float32)

    blur_mod = Blur(C)
    y = jax.block_until_ready(blur_mod(x))

    y_ref = jax.block_until_ready(_reference_blur(x, blur_mod.weight))
    np.testing.assert_allclose(np.asarray(y), np.asarray(y_ref),
                               rtol=1e-5, atol=1e-5)
    assert y.shape == (N, C, H, W)
    print("KERNEL_OK")
</pallas_src>

<mosaic_0001>
module attributes {stable_mosaic.version = 11 : i64} {
  func.func @kernel(%arg0: i32, %arg1: memref<8x256xf32, #tpu.memory_space<vmem>>, %arg2: memref<8x256xf32, #tpu.memory_space<vmem>>) attributes {dimension_semantics = [#tpu.dimension_semantics<parallel>], iteration_bounds = array<i64: 1>, scalar_prefetch = 0 : i64, scratch_operands = 0 : i64, tpu.core_type = #tpu.core_type<tc>, window_params = [{transform_indices = @transform_0, window_bounds = array<i64: 8, 256>}, {transform_indices = @transform_1, window_bounds = array<i64: 8, 256>}]} {
    %c0 = arith.constant 0 : index
    %c0_0 = arith.constant 0 : index
    %0 = vector.load %arg1[%c0, %c0_0] : memref<8x256xf32, #tpu.memory_space<vmem>>, vector<8x256xf32>
    %1 = tpu.iota {dimensions = array<i32: 1>} : vector<8x256xi32>
    %c16_i32 = arith.constant 16 : i32
    %2 = vector.broadcast %c16_i32 : i32 to vector<8x256xi32>
    %3 = arith.cmpi sge, %1, %2 : vector<8x256xi32>
    %c16_i32_1 = arith.constant 16 : i32
    %4 = tpu.dynamic_rotate %0 by %c16_i32_1 dim 1 : vector<8x256xf32>, i32 -> vector<8x256xf32>
    %cst = arith.constant 0.000000e+00 : f32
    %5 = vector.broadcast %cst : f32 to vector<8x256xf32>
    %6 = arith.select %3, %4, %5 : vector<8x256xi1>, vector<8x256xf32>
    %c240_i32 = arith.constant 240 : i32
    %7 = vector.broadcast %c240_i32 : i32 to vector<8x256xi32>
    %8 = arith.cmpi slt, %1, %7 : vector<8x256xi32>
    %c240_i32_2 = arith.constant 240 : i32
    %9 = tpu.dynamic_rotate %0 by %c240_i32_2 dim 1 : vector<8x256xf32>, i32 -> vector<8x256xf32>
    %cst_3 = arith.constant 0.000000e+00 : f32
    %10 = vector.broadcast %cst_3 : f32 to vector<8x256xf32>
    %11 = arith.select %8, %9, %10 : vector<8x256xi1>, vector<8x256xf32>
    %cst_4 = arith.constant 2.000000e+00 : f32
    %12 = vector.broadcast %cst_4 : f32 to vector<8x256xf32>
    %13 = arith.mulf %12, %0 : vector<8x256xf32>
    %14 = arith.addf %13, %6 : vector<8x256xf32>
    %15 = arith.addf %14, %11 : vector<8x256xf32>
    %c16_i32_5 = arith.constant 16 : i32
    %c0_i32 = arith.constant 0 : i32
    %16 = arith.cmpi eq, %c16_i32_5, %c0_i32 : i32
    %c1_i32 = arith.constant 1 : i32
    %17 = arith.select %16, %c1_i32, %c16_i32_5 : i32
    %18 = vector.broadcast %17 : i32 to vector<8x256xi32>
    %19 = arith.remsi %1, %18 : vector<8x256xi32>
    %c0_i32_6 = arith.constant 0 : i32
    %20 = vector.broadcast %c0_i32_6 : i32 to vector<8x256xi32>
    %21 = arith.cmpi ne, %19, %20 : vector<8x256xi32>
    %c0_i32_7 = arith.constant 0 : i32
    %22 = vector.broadcast %c0_i32_7 : i32 to vector<8x256xi32>
    %23 = arith.cmpi slt, %19, %22 : vector<8x256xi32>
    %c0_i32_8 = arith.constant 0 : i32
    %24 = arith.cmpi slt, %17, %c0_i32_8 : i32
    %25 = vector.broadcast %24 : i1 to vector<8x256xi1>
    %26 = vector.broadcast %25 : vector<8x256xi1> to vector<8x256xi1>
    %27 = arith.xori %23, %26 : vector<8x256xi1>
    %28 = arith.andi %27, %21 : vector<8x256xi1>
    %29 = vector.broadcast %17 : i32 to vector<8x256xi32>
    %30 = arith.addi %19, %29 : vector<8x256xi32>
    %31 = arith.select %28, %30, %19 : vector<8x256xi1>, vector<8x256xi32>
    %c1_i32_9 = arith.constant 1 : i32
    %32 = vector.broadcast %c1_i32_9 : i32 to vector<8x256xi32>
    %33 = arith.cmpi sge, %31, %32 : vector<8x256xi32>
    %c1_i32_10 = arith.constant 1 : i32
    %34 = tpu.dynamic_rotate %15 by %c1_i32_10 dim 1 : vector<8x256xf32>, i32 -> vector<8x256xf32>
    %cst_11 = arith.constant 0.000000e+00 : f32
    %35 = vector.broadcast %cst_11 : f32 to vector<8x256xf32>
    %36 = arith.select %33, %34, %35 : vector<8x256xi1>, vector<8x256xf32>
    %c14_i32 = arith.constant 14 : i32
    %37 = vector.broadcast %c14_i32 : i32 to vector<8x256xi32>
    %38 = arith.cmpi sle, %31, %37 : vector<8x256xi32>
    %c255_i32 = arith.constant 255 : i32
    %39 = tpu.dynamic_rotate %15 by %c255_i32 dim 1 : vector<8x256xf32>, i32 -> vector<8x256xf32>
    %cst_12 = arith.constant 0.000000e+00 : f32
    %40 = vector.broadcast %cst_12 : f32 to vector<8x256xf32>
    %41 = arith.select %38, %39, %40 : vector<8x256xi1>, vector<8x256xf32>
    %cst_13 = arith.constant 2.000000e+00 : f32
    %42 = vector.broadcast %cst_13 : f32 to vector<8x256xf32>
    %43 = arith.mulf %42, %15 : vector<8x256xf32>
    %44 = arith.addf %43, %36 : vector<8x256xf32>
    %45 = arith.addf %44, %41 : vector<8x256xf32>
    %cst_14 = arith.constant 6.250000e-02 : f32
    %46 = vector.broadcast %cst_14 : f32 to vector<8x256xf32>
    %47 = arith.mulf %45, %46 : vector<8x256xf32>
    %c0_15 = arith.constant 0 : index
    %c0_16 = arith.constant 0 : index
    %48 = vector.load %arg2[%c0_15, %c0_16] : memref<8x256xf32, #tpu.memory_space<vmem>>, vector<8x256xf32>
    tpu.vector_store %arg2[%c0_15, %c0_16], %47 {strides = array<i32>} : memref<8x256xf32, #tpu.memory_space<vmem>>, vector<8x256xf32>,
    return
  }
  func.func @transform_0(%arg0: i32) -> (i32, i32) {
    %c0_i32 = arith.constant 0 : i32
    %c0_i32_0 = arith.constant 0 : i32
    return %arg0, %c0_i32 : i32, i32
  }
  func.func @transform_1(%arg0: i32) -> (i32, i32) {
    %c0_i32 = arith.constant 0 : i32
    %c0_i32_0 = arith.constant 0 : i32
    return %arg0, %c0_i32 : i32, i32
  }
}

</mosaic_0001>

<bundles_post_ra>
// kernel: tpu_custom_call.1
= control target key start
LH: loop header
LB: loop body
LE: loop exit
PB: predicated region body
PF: predicated region fallthrough
CT: control target
= control target key end

     0   :  { %6 = vsyncpa [#allocation3], 0  ;;  %s209_s0 = inlined_call_operand.hbm [shape: f32[8,256], index: 0, kind: input, shape index: {}]   ;;  %s210_s1 = inlined_call_operand.hbm [shape: f32[8,256], index: 1, kind: output, shape index: {}]  }
   0x1   :  { %7 = vsyncpa [#allocation4], 0  ;;  %s13_s8 = sshll.u32 %s209_s0, 4  ;;  %s187_s9 = smov [#allocation2]   ;;  %s14_s8 = int_to_ptr.hbm [resolvable:$true] %s13_s8 }
   0x2   :  { %s15_s10 = sshll.u32 %s187_s9, 4  ;;  %s16_s10 = int_to_ptr.vmem [resolvable:$true] %s15_s10 }
   0x3   :  { %18 = dma.hbm_to_vmem [thread:$0]  %s14_s8, 256, %s16_s10, [#allocation3]  }
   0x4   :  { %183 = dma.done.wait [#allocation3], 256  }
   0x5   :  { %184 = vsyncadd [#allocation3], 4294967040  ;;  %v23_v0 = vld [vmem:[#allocation2] sm:$0xff]  ;;  %s188_s11 = smov 112   ;;  %s189_s12 = smov 16   ;;  %v24_v1 = vld [vmem:[#allocation2 + $0x8] sm:$0xff]  ;;  %v25_v2 = vlaneseq }
   0x6   :  { %41 = vrot.lane.b32.xlu1 %v23_v0, %s188_s11  ;;  %30 = vrot.lane.b32.xlu0 %v23_v0, %s189_s12  ;;  %v51_v7 = vmul.f32 2.0, %v24_v1  ;;  %v50_v8 = vmul.f32 2.0, %v23_v0  ;;  %s190_s0 = smov 127   ;;  %s191_s13 = smov 1  }
   0x7   :  { %v26_v3 = vand.u32 127, %v25_v2  ;;  %s192_s14 = smov [#allocation5]   ;;  %s119_s18 = sshll.u32 %s210_s1, 4  ;;  %s120_s18 = int_to_ptr.hbm [resolvable:$true] %s119_s18 }
   0x8   :  { %s117_s15 = sshll.u32 %s192_s14, 4  ;;  %s118_s15 = int_to_ptr.vmem [resolvable:$true] %s117_s15 }
   0x9   :  { %v27_v6 = vadd.s32 128, %v26_v3  ;;  %vm45_vm0 = vcmp.lt.s32.totalorder %v26_v3, 112  ;;  %vm34_vm1 = vcmp.lt.s32.totalorder %v26_v3, 16  ;;  %vm28_vm3 = vcmp.ge.s32.totalorder %v26_v3, 16 }
   0xa   :  { %v60_v22 = vand.u32 15, %v26_v3  ;;  %vm86_vm4 = vcmp.lt.s32.totalorder %v26_v3, 1  ;;  %vm97_vm7 = vcmp.lt.s32.totalorder %v26_v3, 127 }
   0xb   :  { %vm40_vm2 = vcmp.lt.s32.totalorder %v27_v6, 240  ;;  %v67_v23 = vand.u32 15, %v27_v6 }
   0xc   :  { %vm80_vm5 = vcmp.ge.s32.totalorder %v60_v22, 1  ;;  %vm91_vm8 = vcmp.le.s32.totalorder %v60_v22, 14 }
   0xd   :  { %vm81_vm6 = vcmp.ge.s32.totalorder %v67_v23, 1  ;;  %vm92_vm9 = vcmp.le.s32.totalorder %v67_v23, 14 }
   0xe   :  { %43 = vrot.lane.b32.xlu1 %v24_v1, %s188_s11  ;;  %32 = vrot.lane.b32.xlu0 %v24_v1, %s189_s12 }
  0x78   :  { %v42_v4 = vpop.permute.xlu1 %41  ;;  %v31_v5 = vpop.permute.xlu0 %30 }
  0x80   :  { %v44_v9 = vpop.permute.xlu1 %43  ;;  %v33_v10 = vpop.permute.xlu0 %32 }
  0x81   :  { %v47_v11 = vsel %vm45_vm0, %v44_v9, %v42_v4  ;;  %v35_v12 = vsel %vm34_vm1, %v31_v5, %v33_v10  ;;  %v36_v13 = vsel %vm34_vm1, %v33_v10, %v31_v5  ;;  %v46_v18 = vsel %vm45_vm0, %v42_v4, %v44_v9 }
  0x82   :  { %v49_v14 = vsel %vm40_vm2, %v47_v11, 0.0  ;;  %v37_v15 = vsel %vm28_vm3, %v36_v13, 0.0  ;;  %v53_v16 = vadd.f32 %v51_v7, %v35_v12 }
  0x83   :  { %v52_v17 = vadd.f32 %v50_v8, %v37_v15 }
  0x84   :  { %v55_v19 = vadd.f32 %v53_v16, %v49_v14 }
  0x85   :  { %v54_v20 = vadd.f32 %v52_v17, %v46_v18 }
  0x86   :  { %95 = vrot.lane.b32.xlu1 %v55_v19, %s190_s0  ;;  %v103_v29 = vmul.f32 2.0, %v55_v19 }
  0x87   :  { %93 = vrot.lane.b32.xlu0 %v54_v20, %s190_s0  ;;  %82 = vrot.lane.b32.xlu2 %v54_v20, %s191_s13  ;;  %v102_v30 = vmul.f32 2.0, %v54_v20 }
  0x8f   :  { %84 = vrot.lane.b32.xlu2 %v55_v19, %s191_s13 }
  0xe1   :  { %v83_v21 = vpop.permute.xlu2 %82 }
  0xe9   :  { %v85_v24 = vpop.permute.xlu2 %84 }
  0xea   :  { %v87_v25 = vsel %vm86_vm4, %v83_v21, %v85_v24  ;;  %v88_v26 = vsel %vm86_vm4, %v85_v24, %v83_v21 }
  0xeb   :  { %v89_v27 = vsel %vm80_vm5, %v88_v26, 0.0  ;;  %v90_v28 = vsel %vm81_vm6, %v87_v25, 0.0 }
  0xec   :  { %v104_v33 = vadd.f32 %v102_v30, %v89_v27  ;;  %v105_v34 = vadd.f32 %v103_v29, %v90_v28 }
  0xf8   :  { %v96_v31 = vpop.permute.xlu1 %95 }
  0xf9   :  { %v94_v32 = vpop.permute.xlu0 %93 }
  0xfa   :  { %v98_v35 = vsel %vm97_vm7, %v94_v32, %v96_v31  ;;  %v99_v36 = vsel %vm97_vm7, %v96_v31, %v94_v32 }
  0xfb   :  { %v100_v37 = vsel %vm91_vm8, %v98_v35, 0.0  ;;  %v101_v38 = vsel %vm92_vm9, %v99_v36, 0.0 }
  0xfc   :  { %v106_v39 = vadd.f32 %v104_v33, %v100_v37  ;;  %v107_v40 = vadd.f32 %v105_v34, %v101_v38 }
  0xfe   :  { %v108_v41 = vmul.f32 0.0625, %v106_v39  ;;  %v109_v42 = vmul.f32 0.0625, %v107_v40 }
 0x100   :  { %110 = vst [vmem:[#allocation5] sm:$0xff] %v108_v41 }
 0x101   :  { %111 = vst [vmem:[#allocation5 + $0x8] sm:$0xff] %v109_v42 }
 0x102   :  { %122 = dma.vmem_to_hbm [thread:$0]  %s118_s15, 256, %s120_s18, [#allocation4]  }
 0x103   :  { %185 = dma.done.wait [#allocation4], 256  }
 0x104   :  { %186 = vsyncadd [#allocation4], 4294967040 }
 0x105   :  { %127 = vsyncpa [#allocation3], 1 }
 0x106   :  { %128 = vsyncpa [#allocation4], 1 }

</bundles_post_ra>
